<compile_context>
chip_gen: v7x
topology: tpu7x:2x2x1
jax: 0.10.0
libtpu: 0.0.40
codegen_flags: <defaults>
</compile_context>

<pallas_src>
import functools
import math

import jax
import jax.numpy as jnp
from jax import lax
from jax.experimental import pallas as pl
from jax.experimental.pallas import tpu as pltpu


def _gelu_exact(x):
    # PyTorch nn.GELU() default (approximate='none'): 0.5*x*(1+erf(x/sqrt(2)))
    return 0.5 * x * (1.0 + lax.erf(x * (1.0 / math.sqrt(2.0))))


def _channel_attention_kernel(x_ref, wd_ref, bd_ref, wu_ref, bu_ref, o_ref, acc_ref,
                              *, hw_total, hw_tile):
    # Grid: (batch blocks, HW tiles).  x_ref block: (Nb, C, hw_tile), lane dim = HW.
    hw_id = pl.program_id(1)

    x = x_ref[...]                                           # native dtype, no upcast
    if hw_total % hw_tile != 0:
        # Tail block: lanes past hw_total hold unspecified data -> mask before max.
        lane = lax.broadcasted_iota(jnp.int32, (1, 1, hw_tile), 2)
        valid = (hw_id * hw_tile + lane) < hw_total
        neg = jnp.asarray(jnp.finfo(x.dtype).min, dtype=x.dtype)
        x = jnp.where(valid, x, neg)

    # Lane-axis max (exact in any float dtype); only the (Nb, C) result is f32.
    tile_max = jnp.max(x, axis=-1).astype(jnp.float32)       # (Nb, C)

    @pl.when(hw_id == 0)
    def _():
        acc_ref[...] = tile_max

    @pl.when(hw_id != 0)
    def _():
        acc_ref[...] = jnp.maximum(acc_ref[...], tile_max)

    # Finalize on the last HW tile: one batched MLP over the Nb pooled rows.
    @pl.when(hw_id == pl.num_programs(1) - 1)
    def _():
        pooled = acc_ref[...]                                            # (Nb, C) f32
        h = jnp.dot(pooled, wd_ref[...],
                    preferred_element_type=jnp.float32) + bd_ref[...]    # (Nb, C//r)
        h = _gelu_exact(h)
        y = jnp.dot(h, wu_ref[...],
                    preferred_element_type=jnp.float32) + bu_ref[...]    # (Nb, C)
        o_ref[...] = y[:, None, :].astype(o_ref.dtype)                   # (Nb, 1, C)


def _pick_batch_tile(n, max_nb=8):
    """Largest divisor of n, capped at 8, that still leaves >= 2 batch blocks when
    n >= 2 (so the 'parallel' batch axis can be sharded across v7x's 2 TCs)."""
    cap = min(max_nb, n)
    if n >= 2:
        cap = min(cap, n // 2)
    cap = max(cap, 1)
    nb = cap
    while n % nb:
        nb -= 1
    return nb


def _pick_hw_tile(hw, nb, c, itemsize, target_bytes=8 * 1024 * 1024):
    """HW tile selection:
      * if the whole (nb, C, HW) slab fits the budget -> hw_tile = HW (one fully
        contiguous DMA, no tail masking);
      * otherwise a 128-multiple tile within ~target_bytes per buffer, with a
        contiguity floor of >= 2 KiB per row, never exceeding 128-padded HW."""
    row_bytes = nb * c * itemsize
    if hw * row_bytes <= target_bytes:
        return hw
    max_rows = max(1, target_bytes // row_bytes)
    t = (min(hw, max_rows) // 128) * 128
    min_rows = max(128, -(-(2048 // max(1, itemsize)) // 128) * 128)  # >= 2 KiB / row
    t = max(t, min_rows)
    t = min(t, -(-hw // 128) * 128)
    return t


def channel_attention(x_nchw, w_down, b_down, w_up, b_up):
    """x_nchw: (N, C, H, W). Weights stored (in, out) so y = x @ W + b.
    Returns (N, C, 1, 1), matching the PyTorch module."""
    N, C, H, W = x_nchw.shape
    HW = H * W
    Ch = w_down.shape[1]  # C // ratio
    itemsize = jnp.dtype(x_nchw.dtype).itemsize

    # Native layout: NCHW -> (N, C, HW) is a free reshape (no transpose pass over HBM).
    x_ncl = x_nchw.reshape(N, C, HW)

    nb = _pick_batch_tile(N)
    hw_tile = _pick_hw_tile(HW, nb, C, itemsize)
    n_hw_tiles = -(-HW // hw_tile)
    grid = (N // nb, n_hw_tiles)

    bd2 = b_down.reshape(1, Ch)
    bu2 = b_up.reshape(1, C)

    # Streamed-input BlockSpec; deeper buffering only when there are enough tiles.
    x_index_map = lambda n, h: (n, 0, h)
    x_buffers = 3 if n_hw_tiles >= 3 else 2
    if x_buffers == 3:
        try:
            x_spec = pl.BlockSpec((nb, C, hw_tile), x_index_map,
                                  pipeline_mode=pl.Buffered(3))
        except TypeError:  # older jax without pipeline_mode on BlockSpec
            x_buffers = 2
            x_spec = pl.BlockSpec((nb, C, hw_tile), x_index_map)
    else:
        x_spec = pl.BlockSpec((nb, C, hw_tile), x_index_map)

    # Explicit VMEM budget derived from the chosen tiling (v5e default 16 MiB would
    # otherwise clamp 8 MiB tiles); stays well under v7x's 64 MiB physical VMEM.
    w_bytes = (w_down.size + w_up.size) * jnp.dtype(w_down.dtype).itemsize
    x_block_bytes = nb * C * hw_tile * itemsize
    vmem_need = (x_buffers * x_block_bytes            # streamed input buffers
                 + 2 * w_bytes                        # double-buffered weights
                 + 2 * (Ch + C) * 4                   # biases
                 + 2 * nb * C * itemsize              # output block
                 + nb * C * 4)                        # accumulator scratch
    vmem_limit = int(min(max(vmem_need + (4 << 20), 32 << 20), 48 << 20))

    cost = pl.CostEstimate(
        flops=int(N * C * HW + 4 * N * C * Ch),       # pooling compares + 2 tiny matmuls
        transcendentals=int(N * Ch),                  # erf in GELU
        bytes_accessed=int(N * C * HW * itemsize + w_bytes
                           + (C + Ch) * 4 + N * C * itemsize),
    )

    kernel = functools.partial(_channel_attention_kernel,
                               hw_total=HW, hw_tile=hw_tile)

    out = pl.pallas_call(
        kernel,
        out_shape=jax.ShapeDtypeStruct((N, 1, C), x_nchw.dtype),
        grid_spec=pltpu.PrefetchScalarGridSpec(
            num_scalar_prefetch=0,
            grid=grid,
            in_specs=[
                x_spec,
                pl.BlockSpec((C, Ch), lambda n, h: (0, 0)),
                pl.BlockSpec((1, Ch), lambda n, h: (0, 0)),
                pl.BlockSpec((Ch, C), lambda n, h: (0, 0)),
                pl.BlockSpec((1, C), lambda n, h: (0, 0)),
            ],
            out_specs=pl.BlockSpec((nb, 1, C), lambda n, h: (n, 0, 0)),
            scratch_shapes=[pltpu.VMEM((nb, C), jnp.float32)],
        ),
        compiler_params=pltpu.CompilerParams(
            dimension_semantics=("parallel", "arbitrary"),
            vmem_limit_bytes=vmem_limit),
        cost_estimate=cost,
    )(x_ncl, w_down, bd2, w_up, bu2)

    return out.reshape(N, C, 1, 1)


def channel_attention_ref(x_nchw, w_down, b_down, w_up, b_up):
    # Pure-JAX reference mirroring the PyTorch forward.
    pooled = jnp.max(x_nchw, axis=(2, 3))            # (N, C)
    h = _gelu_exact(pooled @ w_down + b_down)        # (N, C//r)
    y = h @ w_up + b_up                              # (N, C)
    return y[:, :, None, None]


if __name__ == "__main__":
    # Module config: dim (= channels) must be divisible by ratio=16.
    N, C, H, W = 2, 64, 16, 16
    ratio = 16
    Ch = C // ratio

    key = jax.random.PRNGKey(0)
    kx, kwd, kbd, kwu, kbu = jax.random.split(key, 5)

    x = jax.random.normal(kx, (N, C, H, W), dtype=jnp.float32)

    # Deterministic synthetic parameters (stored as (in, out) for y = x @ W + b).
    w_down = jax.random.normal(kwd, (C, Ch), dtype=jnp.float32) * (1.0 / math.sqrt(C))
    b_down = jax.random.normal(kbd, (Ch,), dtype=jnp.float32) * 0.01
    w_up = jax.random.normal(kwu, (Ch, C), dtype=jnp.float32) * (1.0 / math.sqrt(Ch))
    b_up = jax.random.normal(kbu, (C,), dtype=jnp.float32) * 0.01

    out = channel_attention(x, w_down, b_down, w_up, b_up)
    out = jax.block_until_ready(out)

    ref = channel_attention_ref(x, w_down, b_down, w_up, b_up)
    assert out.shape == (N, C, 1, 1), out.shape
    assert jnp.allclose(out, ref, atol=1e-5, rtol=1e-5), float(jnp.max(jnp.abs(out - ref)))

    print("KERNEL_OK")
</pallas_src>

<mosaic_0001>
module attributes {stable_mosaic.version = 11 : i64} {
  func.func @_channel_attention_kernel(%arg0: i32, %arg1: i32, %arg2: memref<1x64x256xf32, #tpu.memory_space<vmem>>, %arg3: memref<64x4xf32, #tpu.memory_space<vmem>>, %arg4: memref<1x4xf32, #tpu.memory_space<vmem>>, %arg5: memref<4x64xf32, #tpu.memory_space<vmem>>, %arg6: memref<1x64xf32, #tpu.memory_space<vmem>>, %arg7: memref<1x1x64xf32, #tpu.memory_space<vmem>>, %arg8: memref<1x64xf32, #tpu.memory_space<vmem>>) attributes {dimension_semantics = [#tpu.dimension_semantics<parallel>, #tpu.dimension_semantics<arbitrary>], iteration_bounds = array<i64: 2, 1>, scalar_prefetch = 0 : i64, scratch_operands = 1 : i64, tpu.core_type = #tpu.core_type<tc>, window_params = [{transform_indices = @transform_0, window_bounds = array<i64: 1, 64, 256>}, {pipeline_mode = #tpu.pipeline_mode<synchronous>, transform_indices = @transform_1, window_bounds = array<i64: 64, 4>}, {pipeline_mode = #tpu.pipeline_mode<synchronous>, transform_indices = @transform_2, window_bounds = array<i64: 1, 4>}, {pipeline_mode = #tpu.pipeline_mode<synchronous>, transform_indices = @transform_3, window_bounds = array<i64: 4, 64>}, {pipeline_mode = #tpu.pipeline_mode<synchronous>, transform_indices = @transform_4, window_bounds = array<i64: 1, 64>}, {transform_indices = @transform_5, window_bounds = array<i64: 1, 1, 64>}]} {
    %c0 = arith.constant 0 : index
    %c0_0 = arith.constant 0 : index
    %c0_1 = arith.constant 0 : index
    %0 = vector.load %arg2[%c0, %c0_0, %c0_1] : memref<1x64x256xf32, #tpu.memory_space<vmem>>, vector<1x64x256xf32>
    %cst = arith.constant dense<0xFF800000> : vector<1x64xf32>
    %1 = vector.multi_reduction <maximumf>, %0, %cst [2] : vector<1x64x256xf32> to vector<1x64xf32>
    %c0_i32 = arith.constant 0 : i32
    %2 = arith.cmpi eq, %arg1, %c0_i32 : i32
    %3 = arith.extui %2 : i1 to i32
    %c0_i32_2 = arith.constant 0 : i32
    %4 = arith.cmpi ne, %3, %c0_i32_2 : i32
    scf.if %4 {
      %c0_7 = arith.constant 0 : index
      %c0_8 = arith.constant 0 : index
      %11 = vector.load %arg8[%c0_7, %c0_8] : memref<1x64xf32, #tpu.memory_space<vmem>>, vector<1x64xf32>
      tpu.vector_store %arg8[%c0_7, %c0_8], %1 {strides = array<i32>} : memref<1x64xf32, #tpu.memory_space<vmem>>, vector<1x64xf32>,
    } else {
    }
    %c0_i32_3 = arith.constant 0 : i32
    %5 = arith.cmpi ne, %arg1, %c0_i32_3 : i32
    %6 = arith.extui %5 : i1 to i32
    %c0_i32_4 = arith.constant 0 : i32
    %7 = arith.cmpi ne, %6, %c0_i32_4 : i32
    scf.if %7 {
      %c0_7 = arith.constant 0 : index
      %c0_8 = arith.constant 0 : index
      %11 = vector.load %arg8[%c0_7, %c0_8] : memref<1x64xf32, #tpu.memory_space<vmem>>, vector<1x64xf32>
      %12 = arith.maximumf %11, %1 : vector<1x64xf32>
      %c0_9 = arith.constant 0 : index
      %c0_10 = arith.constant 0 : index
      %13 = vector.load %arg8[%c0_9, %c0_10] : memref<1x64xf32, #tpu.memory_space<vmem>>, vector<1x64xf32>
      tpu.vector_store %arg8[%c0_9, %c0_10], %12 {strides = array<i32>} : memref<1x64xf32, #tpu.memory_space<vmem>>, vector<1x64xf32>,
    } else {
    }
    %c0_i32_5 = arith.constant 0 : i32
    %8 = arith.cmpi eq, %arg1, %c0_i32_5 : i32
    %9 = arith.extui %8 : i1 to i32
    %c0_i32_6 = arith.constant 0 : i32
    %10 = arith.cmpi ne, %9, %c0_i32_6 : i32
    scf.if %10 {
      %c0_7 = arith.constant 0 : index
      %c0_8 = arith.constant 0 : index
      %11 = vector.load %arg8[%c0_7, %c0_8] : memref<1x64xf32, #tpu.memory_space<vmem>>, vector<1x64xf32>
      %c0_9 = arith.constant 0 : index
      %c0_10 = arith.constant 0 : index
      %12 = vector.load %arg3[%c0_9, %c0_10] : memref<64x4xf32, #tpu.memory_space<vmem>>, vector<64x4xf32>
      %cst_11 = arith.constant dense<0.000000e+00> : vector<1x4xf32>
      %13 = tpu.matmul %11, %12, %cst_11 {dimension_numbers = #tpu.dot_dimension_numbers<[1], [0], [0], [1], [0, 0, 1, 1], [], []>} : vector<1x64xf32>, vector<64x4xf32>, vector<1x4xf32> -> vector<1x4xf32>
      %c0_12 = arith.constant 0 : index
      %c0_13 = arith.constant 0 : index
      %14 = vector.load %arg4[%c0_12, %c0_13] : memref<1x4xf32, #tpu.memory_space<vmem>>, vector<1x4xf32>
      %15 = arith.addf %13, %14 : vector<1x4xf32>
      %cst_14 = arith.constant 5.000000e-01 : f32
      %16 = vector.broadcast %cst_14 : f32 to vector<1x4xf32>
      %17 = arith.mulf %16, %15 : vector<1x4xf32>
      %cst_15 = arith.constant 0.707106769 : f32
      %18 = vector.broadcast %cst_15 : f32 to vector<1x4xf32>
      %19 = arith.mulf %15, %18 : vector<1x4xf32>
      %20 = math.erf %19 : vector<1x4xf32>
      %cst_16 = arith.constant 1.000000e+00 : f32
      %21 = vector.broadcast %cst_16 : f32 to vector<1x4xf32>
      %22 = arith.addf %21, %20 : vector<1x4xf32>
      %23 = arith.mulf %17, %22 : vector<1x4xf32>
      %c0_17 = arith.constant 0 : index
      %c0_18 = arith.constant 0 : index
      %24 = vector.load %arg5[%c0_17, %c0_18] : memref<4x64xf32, #tpu.memory_space<vmem>>, vector<4x64xf32>
      %cst_19 = arith.constant dense<0.000000e+00> : vector<1x64xf32>
      %25 = tpu.matmul %23, %24, %cst_19 {dimension_numbers = #tpu.dot_dimension_numbers<[1], [0], [0], [1], [0, 0, 1, 1], [], []>} : vector<1x4xf32>, vector<4x64xf32>, vector<1x64xf32> -> vector<1x64xf32>
      %c0_20 = arith.constant 0 : index
      %c0_21 = arith.constant 0 : index
      %26 = vector.load %arg6[%c0_20, %c0_21] : memref<1x64xf32, #tpu.memory_space<vmem>>, vector<1x64xf32>
      %27 = arith.addf %25, %26 : vector<1x64xf32>
      %28 = vector.shape_cast %27 : vector<1x64xf32> to vector<1x1x64xf32>
      %c0_22 = arith.constant 0 : index
      %c0_23 = arith.constant 0 : index
      %c0_24 = arith.constant 0 : index
      %29 = vector.load %arg7[%c0_22, %c0_23, %c0_24] : memref<1x1x64xf32, #tpu.memory_space<vmem>>, vector<1x1x64xf32>
      tpu.vector_store %arg7[%c0_22, %c0_23, %c0_24], %28 {strides = array<i32>} : memref<1x1x64xf32, #tpu.memory_space<vmem>>, vector<1x1x64xf32>,
    } else {
    }
    return
  }
  func.func @transform_0(%arg0: i32, %arg1: i32) -> (i32, i32, i32) {
    %c0_i32 = arith.constant 0 : i32
    %c0_i32_0 = arith.constant 0 : i32
    return %arg0, %c0_i32, %arg1 : i32, i32, i32
  }
  func.func @transform_1(%arg0: i32, %arg1: i32) -> (i32, i32) {
    %c0_i32 = arith.constant 0 : i32
    %c0_i32_0 = arith.constant 0 : i32
    %c0_i32_1 = arith.constant 0 : i32
    return %c0_i32, %c0_i32_0 : i32, i32
  }
  func.func @transform_2(%arg0: i32, %arg1: i32) -> (i32, i32) {
    %c0_i32 = arith.constant 0 : i32
    %c0_i32_0 = arith.constant 0 : i32
    %c0_i32_1 = arith.constant 0 : i32
    return %c0_i32, %c0_i32_0 : i32, i32
  }
  func.func @transform_3(%arg0: i32, %arg1: i32) -> (i32, i32) {
    %c0_i32 = arith.constant 0 : i32
    %c0_i32_0 = arith.constant 0 : i32
    %c0_i32_1 = arith.constant 0 : i32
    return %c0_i32, %c0_i32_0 : i32, i32
  }
  func.func @transform_4(%arg0: i32, %arg1: i32) -> (i32, i32) {
    %c0_i32 = arith.constant 0 : i32
    %c0_i32_0 = arith.constant 0 : i32
    %c0_i32_1 = arith.constant 0 : i32
    return %c0_i32, %c0_i32_0 : i32, i32
  }
  func.func @transform_5(%arg0: i32, %arg1: i32) -> (i32, i32, i32) {
    %c0_i32 = arith.constant 0 : i32
    %c0_i32_0 = arith.constant 0 : i32
    %c0_i32_1 = arith.constant 0 : i32
    return %arg0, %c0_i32, %c0_i32_0 : i32, i32, i32
  }
}

</mosaic_0001>

<bundles_post_ra>
// kernel: tpu_custom_call.1
= control target key start
LH: loop header
LB: loop body
LE: loop exit
PB: predicated region body
PF: predicated region fallthrough
CT: control target
= control target key end

     0   :  { %10 = vsyncpa [#allocation4], 0  ;;  %s1883_s0 = inlined_call_operand.hbm [shape: f32[2,64,256], index: 0, kind: input, shape index: {}]   ;;  %s1884_s1 = inlined_call_operand.vmem [shape: f32[64,4], index: 1, kind: input, shape index: {}]   ;;  %s1885_s2 = inlined_call_operand.vmem [shape: f32[1,4], index: 2, kind: input, shape index: {}]   ;;  %s1886_s3 = inlined_call_operand.vmem [shape: f32[4,64], index: 3, kind: input, shape index: {}]   ;;  %s1887_s4 = inlined_call_operand.vmem [shape: f32[1,64], index: 4, kind: input, shape index: {}]   ;;  %s1888_s5 = inlined_call_operand.hbm [shape: f32[2,1,64], index: 5, kind: output, shape index: {}]  }
   0x1   :  { %12 = vsyncpa [#allocation4 + $0x1], 0 }
   0x2   :  { %13 = vsyncpa [#allocation5], 0 }
   0x3   :  { %15 = vsyncpa [#allocation5 + $0x1], 0  ;;  %s1674_s18 = smov 0   ;;  %s1676_s19 = smov 0  }
   0x4   :  { %s1678_s20 = smov 0   ;;  %s1680_s21 = smov 0  }
   0x5   :  { %s1682_s22 = smov 0   ;;  %s1684_s23 = smov 0  }
   0x6 LB: > { %s1391_s24 = sadd.s32 4294967295, %s1635_s23   ;;  %s1392_s25 = sadd.s32 4294967294, %s1635_s23   ;;  %s1635_s23 = sphi %s1684_s23, %s21_s23   ;;  %s1631_s22 = sphi %s1682_s22, %s1903_s22   ;;  %s1627_s21 = sphi %s1680_s21, %s1902_s21   ;;  %s1623_s20 = sphi %s1678_s20, %s1901_s20   ;;  %s1619_s19 = sphi %s1676_s19, %s1900_s19   ;;  %s1615_s18 = sphi %s1674_s18, %s1899_s18  }
   0x7   : > { %s33_s26 = sadd.s32 1, %s1631_s22  ;;  %s42_s27 = sadd.s32 1, %s1623_s20 }
   0x8   : > { %p35_p0 = scmp.ge.s32.totalorder %s33_s26, 2  ;;  %p49_p1 = scmp.ne.s32.totalorder %s1623_s20, %s1619_s19 }
   0x9   : > { %p50_p2 = scmp.eq.s32.totalorder %s1635_s23, 0  ;;  %p55_p3 = scmp.ne.s32.totalorder %s1619_s19, %s1615_s18 }
   0xa   : > { %s1905_s26 = smov (%p35_p0, %s33_s26), 0  ;;  %p56_p5 = scmp.eq.s32.totalorder %s1391_s24, 0 }
   0xb   : > { %p1715_p4 = por %p50_p2, %p49_p1  ;;  %s37_s29 = ssub.s32 %s1631_s22, %s1905_s26 }
   0xc   : > { %p163_p6 = scmp.eq.s32.totalorder %s1391_s24, 1  ;;  %p40_p7 = scmp.eq.s32.totalorder %s37_s29, 0 }
   0xd   : > { %p1721_p8 = por %p56_p5, %p55_p3  ;;  %p169_p10 = scmp.eq.s32.totalorder %s1392_s25, 1 }
   0xe   : > { %p1725_p9 = por %p163_p6, %p49_p1  ;;  %p1466_p13 = scmp.lt.s32.totalorder %s1635_s23, 2 }
   0xf   : > { %s1730_s7 = scalar_select %p40_p7, %s1623_s20, %s42_s27  }
  0x10   : > { %s1892_s6 = scalar_select %p1725_p9, 1, 0 }
  0x11   : > { %p1732_p11 = por %p169_p10, %p55_p3  ;;  %s201_s9 = sand.u32 1, %s1623_s20  }
  0x12   : > { %s1395_s10 = sshll.u32 %s201_s9, 7  ;;  %s1406_s11 = sshll.u32 %s1631_s22, 11 }
  0x13   : > { %s1893_s8 = scalar_select %p1732_p11, 1, 0 }
  0x14   : > { %s1743_s14 = scalar_lea.hbm %s1883_s0, %s1406_s11  ;;  %s205_s15 = scalar_lea.vmem [#allocation3], %s1395_s10 }
  0x15   : > { %s214_s16 = sshll.u32 %s205_s15, 4  ;;  %p1749_p0 = pnand %p1466_p13, %p1715_p4  ;;  %s1745_s16 = int_to_ptr.vmem [resolvable:$true] %s214_s16 }
  0x16   : > { %s1754_s24 = scalar_lea.sflag [#allocation4], %s201_s9  ;;  %s1523_s25 = scalar_lea.hbm %s1743_s14, 2048 }
  0x17   : > { %p1524_p2 = scmp.ne.s32.totalorder %s1743_s14, %s1523_s25  ;;  %p1525_p3 = pneg %p1749_p0 }
  0x18   : > { %s1528_s28 = scalar_lea.hbm %s1883_s0, 4096  ;;  %p1529_p4 = scmp.lt.u32.totalorder %s1743_s14, %s1883_s0 }
  0x19   : > { %p1526_p5 = pnand %p1525_p3, %p1524_p2  ;;  %p1530_p7 = scmp.lt.u32.totalorder %s1528_s28, %s1523_s25 }
  0x1a   : > { %p1532_p13 = scmp.lt.u32.totalorder %s1523_s25, %s1743_s14 }
  0x1b   : > { %p1527_p6 = pneg %p1526_p5  ;;  %p1531_p10 = por %p1530_p7, %p1529_p4 }
  0x1d   : > { %p1533_p12 = por %p1532_p13, %p1531_p10 }
  0x1f   : > { %p1534_p1 = pnand %p1533_p12, %p1527_p6 }
  0x21   : > { %1537 = shalt.err (!%p1534_p1)
}
  0x22   : > { %s1538_s9 = scalar_lea.vmem %s1745_s16, 2048  ;;  %s1637_s12 = smov [#allocation3]  }
  0x23   : > { %p1539_p2 = scmp.ne.s32.totalorder %s1745_s16, %s1538_s9  ;;  %s1543_s13 = sshll.u32 %s1637_s12, 4  ;;  %s1544_s13 = int_to_ptr.vmem [resolvable:$false] %s1543_s13 }
  0x24   : > { %s1545_s15 = scalar_lea.vmem %s1544_s13, 4096  ;;  %p1546_p9 = scmp.lt.s32.totalorder %s1745_s16, %s1544_s13 }
  0x25   : > { %p1541_p5 = pnand %p1539_p2, %p1525_p3  ;;  %p1547_p4 = scmp.lt.s32.totalorder %s1545_s15, %s1538_s9 }
  0x27   : > { %p1542_p11 = pneg %p1541_p5  ;;  %p1548_p7 = por %p1547_p4, %p1546_p9 }
  0x29   : > { %p1549_p10 = pnand %p1548_p7, %p1542_p11 }
  0x2b   : > { %1552 = shalt.err (!%p1549_p10)
}
  0x2c   : > { %s1638_s25 = smov 256   ;;  %s1639_s27 = smov 16  }
  0x2d   : > { %1461 = dma.hbm_to_vmem [thread:$0]  (!%p1749_p0), %s1743_s14, 2048, %s1745_s16, %s1754_s24, %s1638_s25, %s1638_s25, %s1639_s27  }
  0x2e   : > { %p222_p12 = scmp.lt.s32.totalorder %s1635_s23, 3  ;;  %p1895_p1 = scmp.ge.s32.totalorder %s1635_s23, 1 }
  0x30   : > { %p223_p3 = pnand %p1895_p1, %p222_p12 }
  0x31   : > { %s1786_s29 = sand.u32 (!%p223_p3), 1, %s1619_s19  }
  0x32   : > { %226 = sbr.rel (%p223_p3) target bundleno = 686 (0x2ae), region = 40  ;;  %s1399_s28 = sshll.u32 (!%p223_p3), %s1786_s29, 7 }
  0x33   : > { %s229_s10 = scalar_lea.sflag (!%p223_p3), [#allocation4], %s1786_s29  ;;  %s232_s11 = scalar_lea.vmem (!%p223_p3), [#allocation3], %s1399_s28 }
  0x39   : > { %1606 = dma.done.wait (%p1721_p8), %s229_s10, 2048  }
  0x3a   : > { %1608 = vsyncadd (%p1721_p8), %s229_s10, 4294965248  ;;  %v259_v0 = vld [vmem:[%s232_s11] sm:$0xff]  ;;  %v260_v1 = vld [vmem:[%s232_s11 + $0x8] sm:$0xff]  ;;  %v1640_v27 = vmov 0.0|0.0   ;;  %vm1641_vm0 = vmmov 0   ;;  %v1642_v37 = vmov 0.0   ;;  %v311_v38 = vlaneseq }
  0x3b   : > { %v263_v2 = vld [vmem:[%s232_s11 + $0x20] sm:$0xff]  ;;  %v275_v3 = vmax.f32 %v259_v0, %v260_v1  ;;  %v264_v4 = vld [vmem:[%s232_s11 + $0x28] sm:$0xff]  ;;  %v261_v5 = vld [vmem:[%s232_s11 + $0x10] sm:$0xff]  ;;  %1442 = vmatprep.subr.bf16.mxu0 %v1640_v27  ;;  %1434 = vmatprep.mubr.msk.f32.mxu0 %vm1641_vm0, %v1642_v37  ;;  %vm322_vm1 = vcmask 130112   ;;  %vm329_vm2 = vcmask 195712   ;;  %vm336_vm3 = vcmask 261312  }
  0x3c   : > { %v262_v6 = vld [vmem:[%s232_s11 + $0x18] sm:$0xff]  ;;  %v281_v7 = vmax.f32 %v263_v2, %v264_v4  ;;  %v265_v8 = vld [vmem:[%s232_s11 + $0x30] sm:$0xff]  ;;  %v267_v12 = vld [vmem:[%s232_s11 + $0x40] sm:$0xff]  ;;  %1437 = vmatprep.subr.mxu1 %v1642_v37  ;;  %1439 = vmatprep.mubr.msk.f32.mxu1 %vm1641_vm0, %v1642_v37  ;;  %v312_v39 = vand.u32 127, %v311_v38  ;;  %v314_v40 = vshrl.u32 %v311_v38, 7  ;;  %vm343_vm4 = vcmask 326912  }
  0x3d   : > { %v266_v9 = vld [vmem:[%s232_s11 + $0x38] sm:$0xff]  ;;  %276 = vmax.xlane.f32.xlu0 %v275_v3  ;;  %v278_v10 = vmax.f32 %v261_v5, %v262_v6  ;;  %v268_v13 = vld [vmem:[%s232_s11 + $0x48] sm:$0xff]  ;;  %v269_v14 = vld [vmem:[%s232_s11 + $0x50] sm:$0xff]  ;;  %vm350_vm5 = vcmask 392512   ;;  %vm357_vm6 = vcmask 458112   ;;  %vm364_vm7 = vcmask 523712  }
  0x3e   : > { %282 = vmax.xlane.f32.xlu1 %v281_v7  ;;  %v284_v11 = vmax.f32 %v265_v8, %v266_v9  ;;  %v270_v15 = vld [vmem:[%s232_s11 + $0x58] sm:$0xff]  ;;  %v287_v16 = vmax.f32 %v267_v12, %v268_v13  ;;  %v271_v18 = vld [vmem:[%s232_s11 + $0x60] sm:$0xff]  ;;  %v272_v19 = vld [vmem:[%s232_s11 + $0x68] sm:$0xff]  ;;  %v317_v41 = vadd.s32 4294967288, %v312_v39  ;;  %v324_v42 = vadd.s32 4294967280, %v312_v39  ;;  %s1403_s15 = sshll.u32 %s1627_s21, 4 }
  0x3f   : > { %v290_v17 = vmax.f32 %v269_v14, %v270_v15  ;;  %v273_v20 = vld [vmem:[%s232_s11 + $0x70] sm:$0xff]  ;;  %v274_v21 = vld [vmem:[%s232_s11 + $0x78] sm:$0xff]  ;;  %v293_v22 = vmax.f32 %v271_v18, %v272_v19  ;;  %v1132_v25 = vld [vmem:[%s1884_s1 + $0x8] sm:$0xff]  ;;  %v331_v43 = vadd.s32 4294967272, %v312_v39  ;;  %v315_v45 = vsub.s32 %v312_v39, %v314_v40  ;;  %s257_s25 = scalar_lea.vmem [#allocation6], %s1786_s29  ;;  %s1833_s11 = scalar_lea.hbm %s1888_s5, %s1403_s15 }
  0x40   : > { %v296_v23 = vmax.f32 %v273_v20, %v274_v21  ;;  %v1131_v24 = vld [vmem:[%s1884_s1] sm:$0xff]  ;;  %v1133_v28 = vld [vmem:[%s1884_s1 + $0x10] sm:$0xff]  ;;  %v1134_v29 = vld [vmem:[%s1884_s1 + $0x18] sm:$0xff]  ;;  %v320_v47 = vsub.s32 %v317_v41, %v314_v40  ;;  %v338_v48 = vadd.s32 4294967264, %v312_v39  ;;  %v327_v49 = vsub.s32 %v324_v42, %v314_v40  ;;  %s1314_s27 = sshll.u32 %s257_s25, 4  ;;  %s1302_s30 = scalar_lea.sflag [#allocation5], %s1786_s29  ;;  %s1835_s27 = int_to_ptr.vmem [resolvable:$true] %s1314_s27 }
  0x41   : > { %279 = vmax.xlane.f32.xlu0 %v278_v10  ;;  %v1443_v26 = vpack.c.bf16 %v1132_v25, %v1131_v24  ;;  %v1446_v30 = vpack.c.bf16 %v1134_v29, %v1133_v28  ;;  %v1135_v31 = vld [vmem:[%s1884_s1 + $0x20] sm:$0xff]  ;;  %v1136_v32 = vld [vmem:[%s1884_s1 + $0x28] sm:$0xff]  ;;  %v1137_v34 = vld [vmem:[%s1884_s1 + $0x30] sm:$0xff]  ;;  %v334_v50 = vsub.s32 %v331_v43, %v314_v40  ;;  %v345_v51 = vadd.s32 4294967256, %v312_v39  ;;  %s1553_s14 = scalar_lea.vmem %s1835_s27, 16  ;;  %p1896_p9 = scmp.ne.s32.totalorder %s1892_s6, 0 }
  0x42   : > { %285 = vmax.xlane.f32.xlu1 %v284_v11  ;;  %v1449_v33 = vpack.c.bf16 %v1136_v32, %v1135_v31  ;;  %v1138_v35 = vld [vmem:[%s1884_s1 + $0x38] sm:$0xff]  ;;  %v341_v56 = vsub.s32 %v338_v48, %v314_v40  ;;  %v352_v57 = vadd.s32 4294967248, %v312_v39  ;;  %v359_v61 = vadd.s32 4294967240, %v312_v39  ;;  %p1554_p8 = scmp.ne.s32.totalorder %s1835_s27, %s1553_s14  ;;  %s1643_s21 = smov [#allocation6]  }
  0x43   : > { %1444 = vmatpush3.bf16.msra.mxu0 %v1443_v26  ;;  %v1452_v36 = vpack.c.bf16 %v1138_v35, %v1137_v34  ;;  %v348_v60 = vsub.s32 %v345_v51, %v314_v40  ;;  %vm367_vm8 = vcmask 516096   ;;  %vm1140_vm9 = vcmask 523264   ;;  %v1220_v26 = vld [vmem:[%s1887_s4] sm:$0x1]  ;;  %s1557_s16 = sshll.u32 %s1643_s21, 4  ;;  %s1558_s16 = int_to_ptr.vmem [resolvable:$false] %s1557_s16 }
  0x44   : > { %1445 = vmatprep.subr.bf16.mxu0 %v1640_v27  ;;  %v355_v4 = vsub.s32 %v352_v57, %v314_v40  ;;  %v362_v6 = vsub.s32 %v359_v61, %v314_v40  ;;  %vm1225_vm10 = vcmask 1043456   ;;  %vm1221_vm11 = vcmask 31744   ;;  %p1555_p11 = pnand %p1554_p8, %p1896_p9  ;;  %s1559_s17 = scalar_lea.vmem %s1558_s16, 32 }
  0x45   : > { %288 = vmax.xlane.f32.xlu0 %v287_v16  ;;  %v1219_v16 = vld [vmem:[%s1886_s3] sm:$0xf]  ;;  %p1560_p6 = scmp.lt.s32.totalorder %s1835_s27, %s1558_s16  ;;  %p1561_p13 = scmp.lt.s32.totalorder %s1559_s17, %s1553_s14 }
  0x46   : > { %291 = vmax.xlane.f32.xlu1 %v290_v17  ;;  %1438 = vmatpush3.msk.msra.mxu1 %vm1225_vm10, %v1219_v16  ;;  %v1139_v17 = vld [vmem:[%s1885_s2] sm:$0x1]  ;;  %p1556_p0 = pneg %p1555_p11 }
  0x47   : > { %1447 = vmatpush3.bf16.msra.mxu0 %v1446_v30  ;;  %p1562_p2 = por %p1561_p13, %p1560_p6 }
  0x48   : > { %1448 = vmatprep.subr.bf16.mxu0 %v1640_v27 }
  0x49   : > { %294 = vmax.xlane.f32.xlu0 %v293_v22  ;;  %p1563_p5 = pnand %p1562_p2, %p1556_p0 }
  0x4a   : > { %297 = vmax.xlane.f32.xlu1 %v296_v23 }
  0x4b   : > { %1450 = vmatpush3.bf16.msra.mxu0 %v1449_v33 }
  0x4c   : > { %1451 = vmatprep.subr.bf16.mxu0 %v1640_v27 }
  0x4f   : > { %1453 = vmatpush3.bf16.msra.mxu0 %v1452_v36 }
  0xca   : > { %v277_v44 = vpop.xlane.xlu0 %276 }
  0xcb   : > { %v283_v46 = vpop.xlane.xlu1 %282  ;;  %v316_v53 = vrot.slane %v277_v44, %v315_v45 }
  0xcc   : > { %v328_v58 = vrot.slane %v283_v46, %v327_v49 }
  0xce   : > { %v280_v52 = vpop.xlane.xlu0 %279 }
  0xcf   : > { %v321_v54 = vrot.slane %v280_v52, %v320_v47  ;;  %v286_v55 = vpop.xlane.xlu1 %285 }
  0xd0   : > { %v335_v59 = vrot.slane %v286_v55, %v334_v50 }
  0xd1   : > { %v323_v62 = vsel %vm322_vm1, %v321_v54, %v316_v53 }
  0xd2   : > { %v330_v63 = vsel %vm329_vm2, %v328_v58, %v323_v62  ;;  %v289_v0 = vpop.xlane.xlu0 %288 }
  0xd3   : > { %v337_v1 = vsel %vm336_vm3, %v335_v59, %v330_v63  ;;  %v342_v2 = vrot.slane %v289_v0, %v341_v56  ;;  %v292_v3 = vpop.xlane.xlu1 %291 }
  0xd4   : > { %v349_v5 = vrot.slane %v292_v3, %v348_v60 }
  0xd5   : > { %v344_v7 = vsel %vm343_vm4, %v342_v2, %v337_v1 }
  0xd6   : > { %v295_v8 = vpop.xlane.xlu0 %294  ;;  %v351_v11 = vsel %vm350_vm5, %v349_v5, %v344_v7 }
  0xd7   : > { %v356_v9 = vrot.slane %v295_v8, %v355_v4  ;;  %v298_v10 = vpop.xlane.xlu1 %297 }
  0xd8   : > { %v363_v12 = vrot.slane %v298_v10, %v362_v6 }
  0xd9   : > { %v358_v13 = vsel %vm357_vm6, %v356_v9, %v351_v11 }
  0xda   : > { %v365_v14 = vsel %vm364_vm7, %v363_v12, %v358_v13 }
  0xdb   : > { %368 = vst.msk [vmem:[#allocation2] sm:$0x1] %vm367_vm8, %v365_v14 }
  0xe2   : > { %v1130_v15 = vld [vmem:[#allocation2] sm:$0x1] }
  0xe3   : > { %1435 = vmatmul.mubr.msk.f32.vlgmr.msra.gmra.mrb[0].mxu0 %vm1140_vm9, %v1130_v15 }
 0x1b6   : > { %v1210_v18 = vpop.f32.mrb[0].mxu0 }
 0x1b7   : > { %v1211_v19 = vadd.f32 %v1210_v18, %v1139_v17  ;;  %v1436_v20 = vpop.f32.mrb[1].mxu0 }
 0x1b9   : > { %v1215_v21 = vmul.f32 0.70710677, %v1211_v19  ;;  %v1214_v23 = vmul.f32 0.5, %v1211_v19 }
 0x1bb   : > { %1521 = verf.f32 %v1215_v21 }
 0x1c5   : > { %v1522_v22 = vpop.eup %1521 }
 0x1c6   : > { %v1217_v24 = vadd.f32 1.0, %v1522_v22 }
 0x1c8   : > { %v1218_v25 = vmul.f32 %v1217_v24, %v1214_v23 }
 0x1ca   : > { %1440 = vmatmul.mubr.msk.f32.vlgmr.msra.gmra.mrb[0].mxu1 %vm1221_vm11, %v1218_v25 }
 0x29d   : > { %v1295_v27 = vpop.f32.mrb[0].mxu1 }
 0x29e   : > { %v1296_v28 = vadd.f32 %v1295_v27, %v1220_v26  ;;  %v1441_v29 = vpop.f32.mrb[1].mxu1 }
 0x2a0   : > { %1300 = vst.msk [vmem:[%s257_s25] sm:$0x1] %vm367_vm8, %v1296_v28 }
 0x2a1   : > { %1566 = shalt.err (!%p1563_p5)
}
 0x2a2   : > { %s1567_s29 = scalar_lea.hbm %s1833_s11, 16  ;;  %s1571_s12 = scalar_lea.hbm %s1888_s5, 32 }
 0x2a3   : > { %p1568_p4 = scmp.ne.s32.totalorder %s1833_s11, %s1567_s29  ;;  %p1572_p12 = scmp.lt.u32.totalorder %s1833_s11, %s1888_s5 }
 0x2a4   : > { %p1573_p1 = scmp.lt.u32.totalorder %s1571_s12, %s1567_s29  ;;  %p1575_p8 = scmp.lt.u32.totalorder %s1567_s29, %s1833_s11 }
 0x2a5   : > { %p1569_p7 = pnand %p1568_p4, %p1896_p9 }
 0x2a6   : > { %p1574_p3 = por %p1573_p1, %p1572_p12 }
 0x2a7   : > { %p1570_p10 = pneg %p1569_p7 }
 0x2a8   : > { %p1576_p11 = por %p1575_p8, %p1574_p3 }
 0x2aa   : > { %p1577_p0 = pnand %p1576_p11, %p1570_p10 }
 0x2ac   : > { %1580 = shalt.err (!%p1577_p0)
}
 0x2ad   : > { %1456 = dma.vmem_to_hbm [thread:$0]  (%p1896_p9), %s1835_s27, 16, %s1833_s11, %s1302_s30  }
 0x2ae PF: > { %s1326_s25 = sand.u32 1, %s1615_s18   ;;  %p1897_p6 = scmp.ne.s32.totalorder %s1893_s8, 0 }
 0x2af   : > { %p1898_p13 = scmp.ge.s32.totalorder %s1635_s23, 2  ;;  %s1327_s28 = scalar_lea.sflag [#allocation5], %s1326_s25 }
 0x2b1   : > { %p1463_p2 = pnand %p1898_p13, %p1897_p6 }
 0x2b3   : > { %1610 = dma.done.wait (!%p1463_p2), %s1327_s28, 16  }
 0x2b4   : > { %1612 = vsyncadd (!%p1463_p2), %s1327_s28, 4294967280  ;;  %s21_s23 = sadd.s32 1, %s1635_s23   ;;  %s1899_s18 = smov %s1619_s19 }
 0x2b5   : > { %p18_p5 = scmp.ge.s32.totalorder %s21_s23, 4   ;;  %s1900_s19 = smov %s1623_s20 }
 0x2b6   : > { %s1901_s20 = smov %s1730_s7  ;;  %s1902_s21 = smov %s1631_s22 }
 0x2b7   : > { %s1903_s22 = smov %s1905_s26  ;;  %20 = sbr.rel (!%p18_p5) target bundleno = 6 (0x6), region = 97 }
 0x2be   :  { %1331 = vsyncpa [#allocation4], 1 }
 0x2bf   :  { %1333 = vsyncpa [#allocation4 + $0x1], 1 }
 0x2c0   :  { %1334 = vsyncpa [#allocation5], 1 }
 0x2c1   :  { %1336 = vsyncpa [#allocation5 + $0x1], 1 }

</bundles_post_ra>
